<compile_context>
chip_gen: v5e
topology: v5e:2x2
jax: 0.10.0
libtpu: 0.0.40
codegen_flags: <defaults>
</compile_context>

<pallas_src>
import functools

import jax
import jax.numpy as jnp
from jax.experimental import pallas as pl
from jax.experimental.pallas import tpu as pltpu


# ----------------------------------------------------------------------------
# Kernel A: fused QKV projection  (x @ [Wq*scale | Wk | Wv] + [bq*scale|bk|bv])
# ----------------------------------------------------------------------------
def _qkv_proj_kernel(x_ref, wqkv_ref, bqkv_ref, q_ref, k_ref, v_ref):
    # x_ref:    (1, tr, D)  input dtype
    # wqkv_ref: (D, 3D)     fused weights, attention dtype (grid-invariant)
    # bqkv_ref: (1, 3D)     fused bias, f32
    # q/k/v:    (1, tr, D)  attention-dtype outputs
    D = q_ref.shape[2]
    x = x_ref[0].astype(wqkv_ref.dtype)          # in-register cast -> full MXU rate
    y = jnp.dot(x, wqkv_ref[...], preferred_element_type=jnp.float32)
    y = y + bqkv_ref[...]                        # (tr, 3D), f32 accumulation
    q_ref[0] = y[:, :D].astype(q_ref.dtype)
    k_ref[0] = y[:, D:2 * D].astype(k_ref.dtype)
    v_ref[0] = y[:, 2 * D:].astype(v_ref.dtype)


# ----------------------------------------------------------------------------
# Kernel B: flash-style attention (online softmax) fused with W_o projection
# ----------------------------------------------------------------------------
def _flash_attn_kernel(q_ref, k_ref, v_ref, wo_ref, bo_ref, out_ref,
                       m_sc, l_sc, acc_sc, *, n_heads):
    # q_ref:  (1, tq, D)   Q tile (already scaled by 1/sqrt(Dh)), attn dtype
    # k_ref:  (1, tkv, D)  K tile (heads lane-concatenated)
    # v_ref:  (1, tkv, D)  V tile
    # wo_ref: (D, D)       W_o^T (out = concat_heads @ wo_ref)
    # bo_ref: (1, D)       f32
    # out_ref:(1, tq, D)
    # m_sc/l_sc: (tq, H) f32 running max / running sum (heads along lanes)
    # acc_sc:    (tq, D) f32 un-normalized context (all heads, lane-dense)
    kvi = pl.program_id(2)

    @pl.when(kvi == 0)
    def _init():
        m_sc[...] = jnp.full_like(m_sc, -jnp.inf)
        l_sc[...] = jnp.zeros_like(l_sc)
        acc_sc[...] = jnp.zeros_like(acc_sc)

    H = n_heads
    D = wo_ref.shape[0]
    Dh = D // H
    tq = q_ref.shape[1]
    tkv = k_ref.shape[1]

    q = q_ref[0]                      # (tq, D)
    k = k_ref[0]                      # (tkv, D)
    v = v_ref[0]                      # (tkv, D)
    m_prev = m_sc[...]                # (tq, H) f32
    l_prev = l_sc[...]                # (tq, H) f32
    ones_col = jnp.ones((tkv, 1), dtype=v.dtype)

    m_cols, l_cols, alpha_cols, pv_cols = [], [], [], []
    for h in range(H):                # static unroll over heads
        lo, hi = h * Dh, (h + 1) * Dh
        qh, kh = q[:, lo:hi], k[:, lo:hi]
        s = jax.lax.dot_general(qh, kh, (((1,), (1,)), ((), ())),
                                preferred_element_type=jnp.float32)   # (tq, tkv)
        m_p = m_prev[:, h:h + 1]                                      # (tq, 1)
        m_n = jnp.maximum(m_p, jnp.max(s, axis=-1, keepdims=True))
        alpha = jnp.exp(m_p - m_n)                                    # (tq, 1) f32
        # Big exp in the attention dtype (bf16 EUP on v6e/v7x); p is needed in
        # v's dtype for the PV matmul anyway.
        p = jnp.exp((s - m_n).astype(v.dtype))                        # (tq, tkv)
        # PV matmul with a ones column appended to V: the softmax row-sum is
        # accumulated in f32 on the MXU instead of an XLU cross-lane reduce.
        v_aug = jnp.concatenate([v[:, lo:hi], ones_col], axis=1)      # (tkv, Dh+1)
        pv_aug = jnp.dot(p, v_aug, preferred_element_type=jnp.float32)
        m_cols.append(m_n)
        l_cols.append(alpha * l_prev[:, h:h + 1] + pv_aug[:, Dh:Dh + 1])
        alpha_cols.append(jnp.broadcast_to(alpha, (tq, Dh)))
        pv_cols.append(pv_aug[:, :Dh])

    # Single full-lane-width scratch updates: one vst stream per kv step
    # instead of H masked partial stores.
    m_sc[...] = jnp.concatenate(m_cols, axis=1)
    l_sc[...] = jnp.concatenate(l_cols, axis=1)
    acc_sc[...] = (jnp.concatenate(alpha_cols, axis=1) * acc_sc[...]
                   + jnp.concatenate(pv_cols, axis=1))

    @pl.when(kvi == pl.num_programs(2) - 1)
    def _finalize():
        # Normalize the full-width accumulator and apply W_o as ONE
        # (tq, D) x (D, D) MXU matmul (full-K contraction).
        inv_l = 1.0 / l_sc[...]                                       # (tq, H) f32, exact
        inv_full = jnp.concatenate(
            [jnp.broadcast_to(inv_l[:, h:h + 1], (tq, Dh)) for h in range(H)],
            axis=1)                                                   # (tq, D)
        ctx = (acc_sc[...] * inv_full).astype(wo_ref.dtype)
        o = jnp.dot(ctx, wo_ref[...], preferred_element_type=jnp.float32)
        out_ref[0] = (o + bo_ref[...]).astype(out_ref.dtype)


# ----------------------------------------------------------------------------
# One-time weight prep (hoisted out of the per-call path)
# ----------------------------------------------------------------------------
def prepare_mha_params(params, *, attn_dtype=jnp.bfloat16):
    """Fuse per-head torch-layout weights into lane-dense matrices once:
    wqkv (D, 3D) with the 1/sqrt(Dh) scale folded into Wq/bq (in f32, before
    the attn-dtype cast), bqkv (1, 3D) f32, wo_t = W_o^T (D, D), bo (1, D) f32."""
    H, Dh, D = params['wq'].shape
    scale = 1.0 / float(Dh) ** 0.5

    def fuse(w):  # (H, Dh, D) per-head torch (out, in) -> (D, H*Dh) for x @ W
        return jnp.transpose(w, (2, 0, 1)).reshape(D, H * Dh).astype(jnp.float32)

    wqkv = jnp.concatenate([fuse(params['wq']) * scale,
                            fuse(params['wk']),
                            fuse(params['wv'])], axis=1).astype(attn_dtype)     # (D, 3D)
    bqkv = jnp.concatenate([params['bq'].reshape(-1) * scale,
                            params['bk'].reshape(-1),
                            params['bv'].reshape(-1)]
                           ).astype(jnp.float32)[None, :]                        # (1, 3D)
    wo_t = params['wo'].T.astype(attn_dtype)                                     # (D, D)
    bo = params['bo'].reshape(1, D).astype(jnp.float32)                          # (1, D)
    return dict(wqkv=wqkv, bqkv=bqkv, wo_t=wo_t, bo=bo, n_heads=H)


# ----------------------------------------------------------------------------
# Wrapper
# ----------------------------------------------------------------------------
def multihead_attention(x, prep, *, tr=None, tq=None, tkv=None,
                        vmem_limit_bytes=48 * 1024 * 1024):
    """x: (B, S, D).  prep: output of prepare_mha_params (fused weights)."""
    B, S, D = x.shape
    H = prep['n_heads']
    attn_dtype = prep['wqkv'].dtype
    assert prep['wqkv'].shape == (D, 3 * D) and D % H == 0

    # tq >= 512 keeps kernel B past the bf16 roofline ridge on v6e (~650 f/B)
    # and v7x (~310 f/B); on v5e (ridge ~240) tq=256 is already compute-bound,
    # so pass tq=256 there if VMEM is tight.
    tr = tr if tr is not None else min(512, S)
    tq = tq if tq is not None else min(512, S)
    tkv = tkv if tkv is not None else min(512, S)
    assert S % tr == 0 and S % tq == 0 and S % tkv == 0, \
        "S must be divisible by the tile sizes"

    # --- Kernel A: fused QKV projection ------------------------------------
    qkv_shape = jax.ShapeDtypeStruct((B, S, D), attn_dtype)
    q, k, v = pl.pallas_call(
        _qkv_proj_kernel,
        out_shape=(qkv_shape, qkv_shape, qkv_shape),
        grid_spec=pltpu.PrefetchScalarGridSpec(
            num_scalar_prefetch=0,
            grid=(B, S // tr),
            in_specs=[
                pl.BlockSpec((1, tr, D), lambda b, r: (b, r, 0)),     # x tile
                pl.BlockSpec((D, 3 * D), lambda b, r: (0, 0)),        # fused W (grid-invariant)
                pl.BlockSpec((1, 3 * D), lambda b, r: (0, 0)),        # fused bias
            ],
            out_specs=tuple(pl.BlockSpec((1, tr, D), lambda b, r: (b, r, 0))
                            for _ in range(3)),
        ),
        compiler_params=pltpu.CompilerParams(
            dimension_semantics=("parallel", "parallel"),
            vmem_limit_bytes=vmem_limit_bytes),
    )(x, prep['wqkv'], prep['bqkv'])

    # --- Kernel B: flash attention + output projection ----------------------
    out = pl.pallas_call(
        functools.partial(_flash_attn_kernel, n_heads=H),
        out_shape=jax.ShapeDtypeStruct((B, S, D), x.dtype),
        grid_spec=pltpu.PrefetchScalarGridSpec(
            num_scalar_prefetch=0,
            grid=(B, S // tq, S // tkv),
            in_specs=[
                pl.BlockSpec((1, tq, D),  lambda b, qi, ki: (b, qi, 0)),   # Q tile
                pl.BlockSpec((1, tkv, D), lambda b, qi, ki: (b, ki, 0)),   # K tile
                pl.BlockSpec((1, tkv, D), lambda b, qi, ki: (b, ki, 0)),   # V tile
                pl.BlockSpec((D, D),      lambda b, qi, ki: (0, 0)),       # W_o^T (grid-invariant)
                pl.BlockSpec((1, D),      lambda b, qi, ki: (0, 0)),       # b_o
            ],
            out_specs=pl.BlockSpec((1, tq, D), lambda b, qi, ki: (b, qi, 0)),
            scratch_shapes=[
                pltpu.VMEM((tq, H), jnp.float32),   # running max (heads on lanes)
                pltpu.VMEM((tq, H), jnp.float32),   # running sum (heads on lanes)
                pltpu.VMEM((tq, D), jnp.float32),   # un-normalized context (lane-dense)
            ],
        ),
        compiler_params=pltpu.CompilerParams(
            dimension_semantics=("parallel", "parallel", "arbitrary"),
            vmem_limit_bytes=vmem_limit_bytes),
    )(q, k, v, prep['wo_t'], prep['bo'])
    return out


# ----------------------------------------------------------------------------
# Parameter init (torch nn.Linear layout) and pure-JAX reference
# ----------------------------------------------------------------------------
def init_params(key, d_model, n_heads, dtype=jnp.float32):
    """Per-head weights in PyTorch layout: nn.Linear(d_model, Dh).weight is
    (Dh, d_model); stacked over heads -> (H, Dh, d_model)."""
    Dh = d_model // n_heads
    ks = jax.random.split(key, 8)
    s = 1.0 / float(d_model) ** 0.5
    wq = jax.random.uniform(ks[0], (n_heads, Dh, d_model), dtype, -s, s)
    wk = jax.random.uniform(ks[1], (n_heads, Dh, d_model), dtype, -s, s)
    wv = jax.random.uniform(ks[2], (n_heads, Dh, d_model), dtype, -s, s)
    bq = jax.random.uniform(ks[3], (n_heads, Dh), dtype, -s, s)
    bk = jax.random.uniform(ks[4], (n_heads, Dh), dtype, -s, s)
    bv = jax.random.uniform(ks[5], (n_heads, Dh), dtype, -s, s)
    wo = jax.random.uniform(ks[6], (d_model, d_model), dtype, -s, s)   # (out, in)
    bo = jax.random.uniform(ks[7], (d_model,), dtype, -s, s)
    return dict(wq=wq, wk=wk, wv=wv, bq=bq, bk=bk, bv=bv, wo=wo, bo=bo)


def _reference(x, p):
    """Pure-JAX reference mirroring the PyTorch forward (mask=None)."""
    H, Dh, D = p['wq'].shape
    Q = jnp.einsum('bsd,hed->bhse', x, p['wq']) + p['bq'][None, :, None, :]
    K = jnp.einsum('bsd,hed->bhse', x, p['wk']) + p['bk'][None, :, None, :]
    V = jnp.einsum('bsd,hed->bhse', x, p['wv']) + p['bv'][None, :, None, :]
    s = jnp.einsum('bhse,bhte->bhst', Q, K) / (float(Dh) ** 0.5)
    a = jax.nn.softmax(s, axis=-1)
    heads = jnp.einsum('bhst,bhte->bhse', a, V)
    concat = jnp.transpose(heads, (0, 2, 1, 3)).reshape(x.shape[0], x.shape[1], D)
    return jnp.einsum('bsd,ed->bse', concat, p['wo']) + p['bo']


if __name__ == "__main__":
    B, S, d_model, n_heads = 2, 16, 32, 4
    key = jax.random.PRNGKey(0)
    kx, kp = jax.random.split(key)
    x = jax.random.normal(kx, (B, S, d_model), jnp.float32)
    params = init_params(kp, d_model, n_heads)

    # One-time weight fusion / transpose, hoisted out of the per-call path.
    prep = prepare_mha_params(params, attn_dtype=jnp.bfloat16)

    # Small tiles so the test exercises the multi-tile online-softmax /
    # accumulation path: grid = (B, 2 query tiles, 2 kv tiles).
    out = multihead_attention(x, prep, tr=8, tq=8, tkv=8)
    out = jax.block_until_ready(out)

    ref = _reference(x, params)
    assert out.shape == (B, S, d_model)
    max_err = float(jnp.max(jnp.abs(out - ref)))
    # Tolerance covers the bf16 Q/K/V/exp/W_o intermediates (all accumulation
    # is f32) plus the online-softmax reassociation.
    assert jnp.allclose(out, ref, atol=3e-2, rtol=3e-2), \
        f"mismatch vs reference (max abs err {max_err})"
    print("KERNEL_OK")
</pallas_src>

<mosaic_0001>
module attributes {stable_mosaic.version = 11 : i64} {
  func.func @_qkv_proj_kernel(%arg0: i32, %arg1: i32, %arg2: memref<1x8x32xf32, #tpu.memory_space<vmem>>, %arg3: memref<32x96xbf16, #tpu.memory_space<vmem>>, %arg4: memref<1x96xf32, #tpu.memory_space<vmem>>, %arg5: memref<1x8x32xbf16, #tpu.memory_space<vmem>>, %arg6: memref<1x8x32xbf16, #tpu.memory_space<vmem>>, %arg7: memref<1x8x32xbf16, #tpu.memory_space<vmem>>) attributes {dimension_semantics = [#tpu.dimension_semantics<parallel>, #tpu.dimension_semantics<parallel>], iteration_bounds = array<i64: 2, 2>, scalar_prefetch = 0 : i64, scratch_operands = 0 : i64, tpu.core_type = #tpu.core_type<tc>, window_params = [{transform_indices = @transform_0, window_bounds = array<i64: 1, 8, 32>}, {pipeline_mode = #tpu.pipeline_mode<synchronous>, transform_indices = @transform_1, window_bounds = array<i64: 32, 96>}, {pipeline_mode = #tpu.pipeline_mode<synchronous>, transform_indices = @transform_2, window_bounds = array<i64: 1, 96>}, {transform_indices = @transform_3, window_bounds = array<i64: 1, 8, 32>}, {transform_indices = @transform_4, window_bounds = array<i64: 1, 8, 32>}, {transform_indices = @transform_5, window_bounds = array<i64: 1, 8, 32>}]} {
    %c0 = arith.constant 0 : index
    %c0_0 = arith.constant 0 : index
    %c0_1 = arith.constant 0 : index
    %0 = vector.load %arg2[%c0, %c0_0, %c0_1] : memref<1x8x32xf32, #tpu.memory_space<vmem>>, vector<1x8x32xf32>
    %1 = vector.shape_cast %0 : vector<1x8x32xf32> to vector<8x32xf32>
    %2 = arith.truncf %1 : vector<8x32xf32> to vector<8x32xbf16>
    %c0_2 = arith.constant 0 : index
    %c0_3 = arith.constant 0 : index
    %3 = vector.load %arg3[%c0_2, %c0_3] : memref<32x96xbf16, #tpu.memory_space<vmem>>, vector<32x96xbf16>
    %cst = arith.constant dense<0.000000e+00> : vector<8x96xf32>
    %4 = tpu.matmul %2, %3, %cst {dimension_numbers = #tpu.dot_dimension_numbers<[1], [0], [0], [1], [0, 0, 1, 1], [], []>} : vector<8x32xbf16>, vector<32x96xbf16>, vector<8x96xf32> -> vector<8x96xf32>
    %c0_4 = arith.constant 0 : index
    %c0_5 = arith.constant 0 : index
    %5 = vector.load %arg4[%c0_4, %c0_5] : memref<1x96xf32, #tpu.memory_space<vmem>>, vector<1x96xf32>
    %6 = vector.broadcast %5 : vector<1x96xf32> to vector<8x96xf32>
    %7 = arith.addf %4, %6 : vector<8x96xf32>
    %8 = vector.extract_strided_slice %7 {offsets = [0, 0], sizes = [8, 32], strides = [1, 1]} : vector<8x96xf32> to vector<8x32xf32>
    %9 = arith.truncf %8 : vector<8x32xf32> to vector<8x32xbf16>
    %c0_6 = arith.constant 0 : index
    %c0_7 = arith.constant 0 : index
    %c0_8 = arith.constant 0 : index
    %10 = vector.load %arg5[%c0_6, %c0_7, %c0_8] : memref<1x8x32xbf16, #tpu.memory_space<vmem>>, vector<1x8x32xbf16>
    %11 = vector.shape_cast %10 : vector<1x8x32xbf16> to vector<8x32xbf16>
    %12 = vector.shape_cast %9 : vector<8x32xbf16> to vector<1x8x32xbf16>
    tpu.vector_store %arg5[%c0_6, %c0_7, %c0_8], %12 {strides = array<i32>} : memref<1x8x32xbf16, #tpu.memory_space<vmem>>, vector<1x8x32xbf16>,
    %13 = vector.extract_strided_slice %7 {offsets = [0, 32], sizes = [8, 32], strides = [1, 1]} : vector<8x96xf32> to vector<8x32xf32>
    %14 = arith.truncf %13 : vector<8x32xf32> to vector<8x32xbf16>
    %c0_9 = arith.constant 0 : index
    %c0_10 = arith.constant 0 : index
    %c0_11 = arith.constant 0 : index
    %15 = vector.load %arg6[%c0_9, %c0_10, %c0_11] : memref<1x8x32xbf16, #tpu.memory_space<vmem>>, vector<1x8x32xbf16>
    %16 = vector.shape_cast %15 : vector<1x8x32xbf16> to vector<8x32xbf16>
    %17 = vector.shape_cast %14 : vector<8x32xbf16> to vector<1x8x32xbf16>
    tpu.vector_store %arg6[%c0_9, %c0_10, %c0_11], %17 {strides = array<i32>} : memref<1x8x32xbf16, #tpu.memory_space<vmem>>, vector<1x8x32xbf16>,
    %18 = vector.extract_strided_slice %7 {offsets = [0, 64], sizes = [8, 32], strides = [1, 1]} : vector<8x96xf32> to vector<8x32xf32>
    %19 = arith.truncf %18 : vector<8x32xf32> to vector<8x32xbf16>
    %c0_12 = arith.constant 0 : index
    %c0_13 = arith.constant 0 : index
    %c0_14 = arith.constant 0 : index
    %20 = vector.load %arg7[%c0_12, %c0_13, %c0_14] : memref<1x8x32xbf16, #tpu.memory_space<vmem>>, vector<1x8x32xbf16>
    %21 = vector.shape_cast %20 : vector<1x8x32xbf16> to vector<8x32xbf16>
    %22 = vector.shape_cast %19 : vector<8x32xbf16> to vector<1x8x32xbf16>
    tpu.vector_store %arg7[%c0_12, %c0_13, %c0_14], %22 {strides = array<i32>} : memref<1x8x32xbf16, #tpu.memory_space<vmem>>, vector<1x8x32xbf16>,
    return
  }
  func.func @transform_0(%arg0: i32, %arg1: i32) -> (i32, i32, i32) {
    %c0_i32 = arith.constant 0 : i32
    %c0_i32_0 = arith.constant 0 : i32
    return %arg0, %arg1, %c0_i32 : i32, i32, i32
  }
  func.func @transform_1(%arg0: i32, %arg1: i32) -> (i32, i32) {
    %c0_i32 = arith.constant 0 : i32
    %c0_i32_0 = arith.constant 0 : i32
    %c0_i32_1 = arith.constant 0 : i32
    return %c0_i32, %c0_i32_0 : i32, i32
  }
  func.func @transform_2(%arg0: i32, %arg1: i32) -> (i32, i32) {
    %c0_i32 = arith.constant 0 : i32
    %c0_i32_0 = arith.constant 0 : i32
    %c0_i32_1 = arith.constant 0 : i32
    return %c0_i32, %c0_i32_0 : i32, i32
  }
  func.func @transform_3(%arg0: i32, %arg1: i32) -> (i32, i32, i32) {
    %c0_i32 = arith.constant 0 : i32
    %c0_i32_0 = arith.constant 0 : i32
    return %arg0, %arg1, %c0_i32 : i32, i32, i32
  }
  func.func @transform_4(%arg0: i32, %arg1: i32) -> (i32, i32, i32) {
    %c0_i32 = arith.constant 0 : i32
    %c0_i32_0 = arith.constant 0 : i32
    return %arg0, %arg1, %c0_i32 : i32, i32, i32
  }
  func.func @transform_5(%arg0: i32, %arg1: i32) -> (i32, i32, i32) {
    %c0_i32 = arith.constant 0 : i32
    %c0_i32_0 = arith.constant 0 : i32
    return %arg0, %arg1, %c0_i32 : i32, i32, i32
  }
}

</mosaic_0001>

<bundles_post_ra>
// kernel: tpu_custom_call.1
= control target key start
LH: loop header
LB: loop body
LE: loop exit
PB: predicated region body
PF: predicated region fallthrough
CT: control target
= control target key end

     0   :  { %s1189_s0 = inlined_call_operand.hbm [shape: f32[2,16,32], index: 0, kind: input, shape index: {}]   ;;  %s1190_s1 = inlined_call_operand.hbm [shape: bf16[32,96], index: 1, kind: input, shape index: {}]   ;;  %s1191_s2 = inlined_call_operand.vmem [shape: f32[1,96], index: 2, kind: input, shape index: {}]   ;;  %s1192_s3 = inlined_call_operand.hbm [shape: bf16[2,16,32], index: 3, kind: output, shape index: {0}]   ;;  %s1193_s4 = inlined_call_operand.hbm [shape: bf16[2,16,32], index: 4, kind: output, shape index: {1}]   ;;  %s1194_s5 = inlined_call_operand.hbm [shape: bf16[2,16,32], index: 5, kind: output, shape index: {2}]  }
   0x1   :  { %1202 = sst [smem:[#allocation19_spill]] %s1190_s1 }
   0x2   :  { %1203 = sst [smem:[#allocation20_spill]] %s1193_s4 }
   0x3   :  { %1204 = sst [smem:[#allocation21_spill]] %s1194_s5 }
   0x4   :  { %11 = vsyncpa [#allocation3], 0 }
   0x5   :  { %13 = vsyncpa [#allocation3 + $0x1], 0 }
   0x6   :  { %14 = vsyncpa [#allocation6], 0 }
   0x7   :  { %15 = vsyncpa [#allocation4], 0 }
   0x8   :  { %17 = vsyncpa [#allocation4 + $0x1], 0 }
   0x9   :  { %18 = vsyncpa [#allocation9], 0 }
   0xa   :  { %20 = vsyncpa [#allocation9 + $0x1], 0  ;;  %s972_s18 = smov 0   ;;  %s974_s19 = smov 0  }
   0xb   :  { %s976_s20 = smov 0   ;;  %s978_s21 = smov 0  }
   0xc   :  { %s980_s22 = smov 0   ;;  %s982_s23 = smov 0  }
   0xd   :  { %s984_s24 = smov 0   ;;  %s986_s25 = smov 0  }
   0xe LB: > { %1205 = sst [smem:[#allocation15_spill]] %s907_s18  ;;  %s1013_s26 = sadd.s32 4294967295, %s935_s25   ;;  %s935_s25 = sphi %s986_s25, %s26_s25   ;;  %s931_s24 = sphi %s984_s24, %s1229_s24   ;;  %s927_s23 = sphi %s982_s23, %s1228_s23   ;;  %s923_s22 = sphi %s980_s22, %s1227_s22   ;;  %s919_s21 = sphi %s978_s21, %s1226_s21   ;;  %s915_s20 = sphi %s976_s20, %s1225_s20   ;;  %s911_s19 = sphi %s974_s19, %s1224_s19   ;;  %s907_s18 = sphi %s972_s18, %s1223_s18  }
   0xf   : > { %p575_p0 = scmp.ge.s32.totalorder %s935_s25, 1  ;;  %p61_p1 = scmp.eq.s32.totalorder %s1013_s26, 0 }
  0x10   : > { %p197_p2 = scmp.lt.s32.totalorder %s935_s25, 5  ;;  %s1206_s1 = sld [smem:[#allocation19_spill]] }
  0x11   : > { %s937_s6 = smov [#allocation5]   ;;  %s938_s8 = smov 64  }
  0x12   : > { %p1021_p3 = pnand %p575_p0, %p197_p2  ;;  %s210_s7 = sshll.u32 %s937_s6, 4  ;;  %s211_s7 = int_to_ptr.vmem [resolvable:$true] %s210_s7 }
  0x13   : > { %s939_s9 = smov 4   ;;  %s1195_s10 = sadd.s32 4294967294, %s935_s25  }
  0x14   : > { %p621_p4 = pneg %p1021_p3  ;;  %s35_s11 = sadd.s32 1, %s927_s23 }
  0x15   : > { %s38_s12 = sadd.s32 1, %s931_s24  ;;  %p36_p6 = scmp.ge.s32.totalorder %s35_s11, 2 }
  0x16   : > { %s208_s29 = sshll.u32 %s1206_s1, 4  ;;  %p622_p5 = pnand %p621_p4, %p61_p1  ;;  %s209_s29 = int_to_ptr.hbm [resolvable:$true] %s208_s29 }
  0x17   : > { %s47_s13 = sadd.s32 1, %s915_s20  ;;  %p54_p7 = scmp.ne.s32.totalorder %s915_s20, %s911_s19 }
  0x18   : > { %624 = dma.hbm_to_vmem [thread:$0]  (!%p622_p5), %s209_s29, 256, %s211_s7, [#allocation6], %s938_s8, %s938_s8, %s939_s9  }
  0x19   : > { %p55_p8 = scmp.eq.s32.totalorder %s935_s25, 0  ;;  %s1231_s11 = smov (%p36_p6, %s35_s11), 0 }
  0x1a   : > { %1208 = sst [smem:[#allocation16_spill]] %s1231_s11  ;;  %s1233_s12 = smov (!%p36_p6, %s38_s12), %s931_s24 }
  0x1b   : > { %s43_s14 = ssub.s32 %s927_s23, %s1231_s11  ;;  %p1041_p9 = por %p55_p8, %p54_p7 }
  0x1c   : > { %p40_p10 = scmp.ge.s32.totalorder %s1233_s12, 2  ;;  %p60_p11 = scmp.ne.s32.totalorder %s911_s19, %s907_s18 }
  0x1d   : > { %p128_p12 = scmp.eq.s32.totalorder %s1013_s26, 3  ;;  %p134_p13 = scmp.eq.s32.totalorder %s1195_s10, 3 }
  0x1e   : > { %s1235_s12 = smov (%p40_p10, %s1233_s12), 0  ;;  %p1054_p0 = por %p61_p1, %p60_p11 }
  0x1f   : > { %1210 = sst [smem:[#allocation17_spill]] %s1235_s12  ;;  %p1058_p2 = por %p128_p12, %p54_p7 }
  0x20   : > { %s42_s27 = ssub.s32 %s931_s24, %s1235_s12  ;;  %p1064_p4 = por %p134_p13, %p60_p11 }
  0x21   : > { %s44_s29 = sor.u32 %s43_s14, %s42_s27  ;;  %p640_p5 = scmp.lt.s32.totalorder %s935_s25, 4 }
  0x22   : > { %s1213_s28 = scalar_select %p1064_p4, 1, 0 }
  0x23   : > { %p45_p6 = scmp.eq.s32.totalorder %s44_s29, 0  ;;  %s227_s6 = sand.u32 1, %s915_s20  }
  0x24   : > { %1214 = sst [smem:[#allocation18_spill]] %s1213_s28  ;;  %s578_s7 = sshll.u32 %s227_s6, 3 }
  0x25   : > { %s1071_s8 = scalar_select %p45_p6, %s915_s20, %s47_s13  }
  0x26   : > { %s579_s9 = sshll.u32 %s931_s24, 1  ;;  %s231_s1 = scalar_lea.vmem [#allocation2], %s578_s7 }
  0x27   : > { %s235_s10 = sadd.s32 %s927_s23, %s579_s9  ;;  %s241_s11 = sshll.u32 %s231_s1, 4  ;;  %s242_s11 = int_to_ptr.vmem [resolvable:$true] %s241_s11 }
  0x28   : > { %s580_s18 = sshll.u32 %s235_s10, 3  ;;  %p626_p7 = pnand %p640_p5, %p1041_p9 }
  0x29   : > { %s237_s12 = scalar_lea.hbm %s1189_s0, %s580_s18  ;;  %s228_s14 = scalar_lea.sflag [#allocation3], %s227_s6 }
  0x2a   : > { %s239_s28 = sshll.u32 %s237_s12, 4  ;;  %250 = sbr.rel (%p1021_p3) target bundleno = 319 (0x13f), region = 32  ;;  %s240_s28 = int_to_ptr.hbm [resolvable:$true] %s239_s28 }
  0x2b   : > { %628 = dma.hbm_to_vmem [thread:$0]  (!%p626_p7), %s240_s28, 128, %s242_s11, %s228_s14  }
  0x2c   : > { %s1083_s13 = sand.u32 (!%p1021_p3), 1, %s911_s19  }
  0x2d   : > { %s582_s1 = sshll.u32 (!%p1021_p3), %s1083_s13, 3  ;;  %s253_s10 = scalar_lea.sflag (!%p1021_p3), [#allocation3], %s1083_s13 }
  0x2e   : > { %s256_s27 = scalar_lea.vmem (!%p1021_p3), [#allocation2], %s582_s1 }
  0x2f   : > { %890 = dma.done.wait (%p1054_p0), %s253_s10, 128  }
  0x30   : > { %892 = vsyncadd (%p1054_p0), %s253_s10, 4294967168 }
  0x31   : > { %894 = dma.done.wait (%p61_p1), [#allocation6], 256  }
  0x32   : > { %896 = vsyncadd (%p61_p1), [#allocation6], 4294967040  ;;  %v608_v0 = vld [vmem:[#allocation5 + $0x8] sm:$0xff]  ;;  %v607_v1 = vld [vmem:[#allocation5] sm:$0xff]  ;;  %vm322_vm0 = vcmask 261120   ;;  %s599_s4 = sshll.u32 %s923_s22, 1 }
  0x33   : > { %332 = vmatpush.bf16.msra.mxu0 %v608_v0  ;;  %v300_v2 = vld [vmem:[%s256_s27] sm:$0xff]  ;;  %s372_s5 = sadd.s32 %s919_s21, %s599_s4  ;;  %s1101_s11 = sshll.u32 %s1083_s13, 2  ;;  %vm340_vm1 = vcmask 257024  }
  0x34   : > { %v301_v3 = vpack.c.bf16 %v300_v2, %v300_v2  ;;  %v712_v4 = vld [vmem:[%s1191_s2] ss:$0 sm:$0xff]  ;;  %s1103_s12 = sshll.u32 %s372_s5, 2  ;;  %s284_s21 = scalar_lea.vmem [#allocation7], %s1101_s11 }
  0x35   : > { %s374_s28 = scalar_lea.hbm %s1192_s3, %s1103_s12  ;;  %s376_s22 = sshll.u32 %s284_s21, 4  ;;  %s377_s22 = int_to_ptr.vmem [resolvable:$true] %s376_s22 }
  0x36   : > { %s378_s29 = sshll.u32 %s374_s28, 4  ;;  %s940_s6 = smov 96   ;;  %s379_s29 = int_to_ptr.hbm [resolvable:$true] %s378_s29 }
  0x37   : > { %333 = vmatpush.bf16.msra.mxu0 %v607_v1  ;;  %s352_s7 = scalar_lea.sflag [#allocation4], %s1083_s13  ;;  %s787_s9 = sshra.s32 %s379_s29, 4  ;;  %s788_s9 = int_to_ptr.hbm [resolvable:$true] %s787_s9 }
  0x38   : > { %s789_s14 = scalar_lea.hbm %s788_s9, 4  ;;  %s793_s27 = scalar_lea.hbm %s1192_s3, 16 }
  0x39   : > { %p790_p1 = scmp.ne.s32.totalorder %s788_s9, %s789_s14  ;;  %p794_p9 = scmp.lt.s32.totalorder %s788_s9, %s1192_s3 }
  0x3a   : > { %595 = vmatmul.msk.bf16.vlgmr.msra.gmra.mxu0 %vm322_vm0, %v301_v3  ;;  %p795_p10 = scmp.lt.s32.totalorder %s793_s27, %s789_s14 }
  0x3b   : > { %p791_p3 = pnand %p790_p1, %p1058_p2 }
  0x3c   : > { %p796_p11 = por %p795_p10, %p794_p9 }
  0x3d   : > { %p792_p8 = pneg %p791_p3 }
  0x3f   : > { %p797_p12 = pnand %p796_p11, %p792_p8 }
  0xb7   : > { %v335_v5 = vpop.f32.mrf.mxu0 }
  0xb8   : > { %v336_v6 = vadd.f32 %v712_v4, %v335_v5 }
  0xba   : > { %v339_v7 = vpack.c.bf16 %v336_v6, %v336_v6 }
  0xbc   : > { %343 = vrot.lane.b32.xlu0 %v339_v7, %s940_s6  ;;  %341 = vst.msk [vmem:[%s284_s21] sm:$0xf] %vm340_vm1, %v339_v7 }
  0xbd   : > { %800 = shalt.err (!%p797_p12)
}
  0xbe   : > { %615 = dma.vmem_to_hbm [thread:$0]  (%p1058_p2), %s377_s22, 64, %s379_s29, %s352_s7  }
  0xbf   : > { %v337_v8 = vpop.f32.mrf.mxu0  ;;  %s941_s13 = smov 64   ;;  %s1215_s15 = sld [smem:[#allocation20_spill]] }
  0xc0   : > { %s356_s28 = sand.u32 1, %s1013_s26   ;;  %s291_s21 = scalar_lea.vmem [#allocation8], %s1101_s11 }
  0xc1   : > { %s392_s6 = sshll.u32 %s291_s21, 4  ;;  %s1216_s22 = sld [smem:[#allocation21_spill]]  ;;  %s393_s6 = int_to_ptr.vmem [resolvable:$true] %s392_s6 }
  0xc2   : > { %s1133_s10 = scalar_lea.sflag [#allocation9], %s356_s28 }
  0xc4   : > { %347 = vrot.lane.b32.xlu0 %v339_v7, %s941_s13 }
  0xc5   : > { %s390_s16 = scalar_lea.hbm %s1215_s15, %s1103_s12  ;;  %s821_s13 = scalar_lea.hbm %s1215_s15, 16 }
  0xc6   : > { %s394_s9 = sshll.u32 %s390_s16, 4  ;;  %s395_s9 = int_to_ptr.hbm [resolvable:$true] %s394_s9 }
  0xc7   : > { %s1217_s29 = smov %s1216_s22  ;;  %s406_s7 = scalar_lea.hbm %s1216_s22, %s1103_s12 }
  0xc8   : > { %s815_s27 = sshra.s32 %s395_s9, 4  ;;  %s816_s27 = int_to_ptr.hbm [resolvable:$true] %s815_s27 }
  0xc9   : > { %s817_s4 = scalar_lea.hbm %s816_s27, 4  ;;  %p822_p6 = scmp.lt.s32.totalorder %s816_s27, %s1215_s15 }
  0xca   : > { %p818_p13 = scmp.ne.s32.totalorder %s816_s27, %s817_s4  ;;  %p823_p7 = scmp.lt.s32.totalorder %s821_s13, %s817_s4 }
  0xcc   : > { %p819_p0 = pnand %p818_p13, %p1058_p2  ;;  %p824_p1 = por %p823_p7, %p822_p6 }
  0xce   : > { %p820_p5 = pneg %p819_p0 }
  0xd0   : > { %p825_p3 = pnand %p824_p1, %p820_p5 }
 0x12e   : > { %v344_v9 = vpop.permute.xlu0 %343 }
 0x12f   : > { %346 = vst.msk [vmem:[%s291_s21] sm:$0xf] %vm340_vm1, %v344_v9 }
 0x130   : > { %828 = shalt.err (!%p825_p3)
}
 0x131   : > { %616 = dma.vmem_to_hbm [thread:$0]  (%p1058_p2), %s393_s6, 64, %s395_s9, %s1133_s10  }
 0x132   : > { %s298_s12 = scalar_lea.vmem [#allocation10], %s1101_s11  ;;  %s410_s28 = sshll.u32 %s406_s7, 4  ;;  %s411_s28 = int_to_ptr.hbm [resolvable:$true] %s410_s28 }
 0x133   : > { %s408_s16 = sshll.u32 %s298_s12, 4  ;;  %s843_s21 = sshra.s32 %s411_s28, 4  ;;  %s409_s16 = int_to_ptr.vmem [resolvable:$true] %s408_s16  ;;  %s844_s21 = int_to_ptr.hbm [resolvable:$true] %s843_s21 }
 0x134   : > { %s845_s14 = scalar_lea.hbm %s844_s21, 4  ;;  %s849_s27 = scalar_lea.hbm %s1217_s29, 16 }
 0x135   : > { %p846_p8 = scmp.ne.s32.totalorder %s844_s21, %s845_s14  ;;  %p850_p11 = scmp.lt.s32.totalorder %s844_s21, %s1217_s29 }
 0x136   : > { %v348_v10 = vpop.permute.xlu0 %347  ;;  %p851_p12 = scmp.lt.s32.totalorder %s849_s27, %s845_s14 }
 0x137   : > { %350 = vst.msk [vmem:[%s298_s12] sm:$0xf] %vm340_vm1, %v348_v10  ;;  %p847_p9 = pnand %p846_p8, %p1058_p2 }
 0x138   : > { %p852_p13 = por %p851_p12, %p850_p11 }
 0x139   : > { %p848_p10 = pneg %p847_p9 }
 0x13b   : > { %p853_p0 = pnand %p852_p13, %p848_p10 }
 0x13d   : > { %856 = shalt.err (!%p853_p0)
}
 0x13e   : > { %617 = dma.vmem_to_hbm [thread:$0]  (%p1058_p2), %s409_s16, 64, %s411_s28, %s1133_s10  }
 0x13f PF: > { %s1218_s9 = sld [smem:[#allocation15_spill]]  ;;  %p642_p5 = scmp.ge.s32.totalorder %s935_s25, 2 }
 0x141   : > { %p630_p6 = pnand %p642_p5, %p1064_p4 }
 0x143   : > { %p631_p7 = pneg %p630_p6 }
 0x145   : > { %s422_s4 = sand.u32 1, %s1218_s9  }
 0x146   : > { %s423_s26 = scalar_lea.sflag [#allocation4], %s422_s4 }
 0x147   : > { %898 = dma.done.wait (%p631_p7), %s423_s26, 64  }
 0x148   : > { %900 = vsyncadd (%p631_p7), %s423_s26, 4294967232  ;;  %s1220_s5 = sadd.s32 4294967294, %s935_s25  }
 0x149   : > { %s432_s13 = sand.u32 1, %s1220_s5  }
 0x14a   : > { %s433_s18 = scalar_lea.sflag [#allocation9], %s432_s13 }
 0x14b   : > { %902 = dma.done.wait (%p631_p7), %s433_s18, 128  }
 0x14c   : > { %904 = vsyncadd (%p631_p7), %s433_s18, 4294967168  ;;  %s26_s25 = sadd.s32 1, %s935_s25   ;;  %s1221_s17 = sld [smem:[#allocation16_spill]] }
 0x14d   : > { %p23_p2 = scmp.ge.s32.totalorder %s26_s25, 6   ;;  %s1222_s10 = sld [smem:[#allocation17_spill]] }
 0x14e   : > { %s1223_s18 = smov %s911_s19  ;;  %s1224_s19 = smov %s915_s20 }
 0x14f   : > { %s1225_s20 = smov %s1071_s8  ;;  %s1226_s21 = smov %s927_s23 }
 0x150   : > { %s1227_s22 = smov %s931_s24  ;;  %25 = sbr.rel (!%p23_p2) target bundleno = 14 (0xe), region = 113 }
 0x152   : > { %s1228_s23 = smov %s1221_s17 }
 0x153   : > { %s1229_s24 = smov %s1222_s10 }
 0x155   :  { %449 = vsyncpa [#allocation3], 1 }
 0x156   :  { %451 = vsyncpa [#allocation3 + $0x1], 1 }
 0x157   :  { %452 = vsyncpa [#allocation6], 1 }
 0x158   :  { %453 = vsyncpa [#allocation4], 1 }
 0x159   :  { %455 = vsyncpa [#allocation4 + $0x1], 1 }
 0x15a   :  { %456 = vsyncpa [#allocation9], 1 }
 0x15b   :  { %458 = vsyncpa [#allocation9 + $0x1], 1 }

</bundles_post_ra>
